<compile_context>
chip_gen: v5e
topology: v5e:2x2
jax: 0.10.0
libtpu: 0.0.40
codegen_flags: <defaults>
</compile_context>

<pallas_src>
import jax
import jax.numpy as jnp
from jax.experimental import pallas as pl
from jax.experimental.pallas import tpu as pltpu


def _round_up(v, m):
    return pl.cdiv(v, m) * m


def _glu_kernel(x_ref, w_ref, b_ref, out_ref):
    # x_ref:   (TM, K)     tile of flattened input rows
    # w_ref:   (K, 2H)     fused [Wa^T | Wg^T] weights (K-major)
    # b_ref:   (1, 2H)     fused [ba | bg] bias
    # out_ref: (TM, 2H)    lane-dense fused slab [act*sigmoid(gate) | sigmoid(gate)]
    h = out_ref.shape[-1] // 2
    x = x_ref[...].astype(w_ref.dtype)            # cast for the MXU (bf16 weights ok)
    fused = jnp.dot(x, w_ref[...], preferred_element_type=jnp.float32)
    fused = fused + b_ref[...].astype(jnp.float32)
    act = fused[:, :h]
    gate = jax.nn.sigmoid(fused[:, h:])           # f32 sigmoid (EUP)
    # Single lane-dense store: one output DMA stream per grid step.
    out_ref[...] = jnp.concatenate([act * gate, gate], axis=-1).astype(out_ref.dtype)


def prepare_glu_params(wa, ba, wg, bg, compute_dtype=None):
    """Fuse torch-style Linear params into K-major operands. Call ONCE at init.

    wa, wg: (hidden, input) like torch.nn.Linear.weight; ba, bg: (hidden,).
    Returns (w_fused (K, 2H), b_fused (1, 2H) in f32).
    """
    h = wa.shape[0]
    w_fused = jnp.concatenate([wa.T, wg.T], axis=1)                # (K, 2H)
    b_fused = jnp.concatenate([ba, bg]).reshape(1, 2 * h).astype(jnp.float32)
    if compute_dtype is not None:
        w_fused = w_fused.astype(compute_dtype)
    return w_fused, b_fused


def glu_forward(x, w_fused, b_fused, *, tile_m=2048, min_grid_steps=2,
                out_dtype=None, split_outputs=True,
                weight_buffer_count=None, vmem_limit_bytes=None):
    """x: (..., input_size). w_fused: (K, 2H) K-major, b_fused: (1, 2H).

    Returns (act * sigmoid(gate), sigmoid(gate)) with trailing dim H, or the
    fused (..., 2H) slab when split_outputs=False (lets a fused consumer skip
    the post-kernel split copies).
    """
    orig_shape = x.shape
    k = orig_shape[-1]
    two_h = w_fused.shape[1]
    h = two_h // 2

    x2 = x.reshape(-1, k)
    m = x2.shape[0]
    out_dtype = x.dtype if out_dtype is None else out_dtype

    # M tile: multiple of 8 (sublane), big (default 2048) to amortize the
    # per-grid-step overhead; no bigger than needed for small M.
    tm = int(max(8, min(_round_up(tile_m, 8), _round_up(m, 8))))
    # Keep at least `min_grid_steps` steps on the "parallel" M axis (when M
    # allows) so the grid shards across both TensorCores on v7x megacore.
    if min_grid_steps > 1 and m > min_grid_steps * 8 and pl.cdiv(m, tm) < min_grid_steps:
        tm = int(max(8, _round_up(pl.cdiv(m, min_grid_steps), 8)))

    grid = (pl.cdiv(m, tm),)   # ragged last block: OOB reads padded, OOB writes dropped

    cp_kwargs = dict(dimension_semantics=("parallel",))
    if vmem_limit_bytes is not None:
        cp_kwargs["vmem_limit_bytes"] = vmem_limit_bytes

    # Constant-index (VMEM-resident) weight/bias specs; optionally single-buffered
    # for large-shape v7x deployments (64 MiB physical VMEM).
    wb_spec_kwargs = {}
    if weight_buffer_count is not None:
        wb_spec_kwargs["pipeline_mode"] = pl.Buffered(weight_buffer_count)
    w_spec = pl.BlockSpec((k, two_h), lambda i: (0, 0), **wb_spec_kwargs)
    b_spec = pl.BlockSpec((1, two_h), lambda i: (0, 0), **wb_spec_kwargs)

    x_bytes = jnp.dtype(x2.dtype).itemsize
    w_bytes = jnp.dtype(w_fused.dtype).itemsize
    o_bytes = jnp.dtype(out_dtype).itemsize
    cost = pl.CostEstimate(
        flops=2 * m * k * two_h + 3 * m * two_h,
        transcendentals=m * h,
        bytes_accessed=m * k * x_bytes + k * two_h * w_bytes
                       + two_h * 4 + m * two_h * o_bytes,
    )

    fused_out = pl.pallas_call(
        _glu_kernel,
        out_shape=jax.ShapeDtypeStruct((m, two_h), out_dtype),
        grid_spec=pltpu.PrefetchScalarGridSpec(
            num_scalar_prefetch=0,
            grid=grid,
            in_specs=[
                pl.BlockSpec((tm, k), lambda i: (i, 0)),   # x rows tile (streams)
                w_spec,                                    # fused weights (resident)
                b_spec,                                    # fused bias (resident)
            ],
            out_specs=pl.BlockSpec((tm, two_h), lambda i: (i, 0)),
        ),
        compiler_params=pltpu.CompilerParams(**cp_kwargs),
        cost_estimate=cost,
    )(x2, w_fused, b_fused)

    fused_nd = fused_out.reshape(orig_shape[:-1] + (two_h,))
    if not split_outputs:
        return fused_nd
    return fused_nd[..., :h], fused_nd[..., h:]


def glu_reference(x, wa, ba, wg, bg):
    act = jnp.einsum("...k,hk->...h", x, wa) + ba
    gat = jax.nn.sigmoid(jnp.einsum("...k,hk->...h", x, wg) + bg)
    return act * gat, gat


if __name__ == "__main__":
    # Shapes consistent with the module: GLU(input_size=32, hidden=32),
    # applied to x of shape (batch=2, seq=8, input_size=32).
    batch, seq, input_size, hidden = 2, 8, 32, 32

    key = jax.random.PRNGKey(0)
    kx, kwa, kba, kwg, kbg, kx2 = jax.random.split(key, 6)

    x = jax.random.normal(kx, (batch, seq, input_size), dtype=jnp.float32)
    # Deterministic init mimicking torch.nn.Linear's U(-1/sqrt(fan_in), 1/sqrt(fan_in)).
    bound = 1.0 / (input_size ** 0.5)
    wa = jax.random.uniform(kwa, (hidden, input_size), jnp.float32, -bound, bound)
    ba = jax.random.uniform(kba, (hidden,), jnp.float32, -bound, bound)
    wg = jax.random.uniform(kwg, (hidden, input_size), jnp.float32, -bound, bound)
    bg = jax.random.uniform(kbg, (hidden,), jnp.float32, -bound, bound)

    ref_out, ref_gate = glu_reference(x, wa, ba, wg, bg)

    # --- f32 path (large-tile defaults) ----------------------------------
    w_fused, b_fused = prepare_glu_params(wa, ba, wg, bg)
    out, gate = glu_forward(x, w_fused, b_fused)
    out = jax.block_until_ready(out)
    gate = jax.block_until_ready(gate)
    assert out.shape == (batch, seq, hidden)
    assert gate.shape == (batch, seq, hidden)
    assert jnp.allclose(out, ref_out, atol=1e-5, rtol=1e-5)
    assert jnp.allclose(gate, ref_gate, atol=1e-5, rtol=1e-5)

    # --- ragged M path (cdiv grid partial last block, no jnp.pad / [:m]) --
    x_r = jax.random.normal(kx2, (3, 10, input_size), dtype=jnp.float32)
    out_r, gate_r = glu_forward(x_r, w_fused, b_fused)
    out_r = jax.block_until_ready(out_r)
    gate_r = jax.block_until_ready(gate_r)
    ref_out_r, ref_gate_r = glu_reference(x_r, wa, ba, wg, bg)
    assert out_r.shape == (3, 10, hidden)
    assert jnp.allclose(out_r, ref_out_r, atol=1e-5, rtol=1e-5)
    assert jnp.allclose(gate_r, ref_gate_r, atol=1e-5, rtol=1e-5)

    # --- fused-slab output (consumer takes the lane-dense (.., 2H) slab) --
    slab = glu_forward(x, w_fused, b_fused, split_outputs=False)
    slab = jax.block_until_ready(slab)
    assert slab.shape == (batch, seq, 2 * hidden)
    assert jnp.allclose(slab[..., :hidden], ref_out, atol=1e-5, rtol=1e-5)
    assert jnp.allclose(slab[..., hidden:], ref_gate, atol=1e-5, rtol=1e-5)

    # --- bf16-weight MXU path (f32 x, f32 accumulation), loose tolerance --
    w_bf16, b_f32 = prepare_glu_params(wa, ba, wg, bg, compute_dtype=jnp.bfloat16)
    out_b, gate_b = glu_forward(x, w_bf16, b_f32)
    out_b = jax.block_until_ready(out_b)
    gate_b = jax.block_until_ready(gate_b)
    assert jnp.allclose(out_b, ref_out, atol=5e-2, rtol=5e-2)
    assert jnp.allclose(gate_b, ref_gate, atol=5e-2, rtol=5e-2)

    # --- full bf16 streaming (producer emits bf16 x, bf16 outputs) --------
    x_bf = x.astype(jnp.bfloat16)
    out_s, gate_s = glu_forward(x_bf, w_bf16, b_f32)     # out_dtype defaults to x.dtype
    out_s = jax.block_until_ready(out_s)
    gate_s = jax.block_until_ready(gate_s)
    assert out_s.dtype == jnp.bfloat16 and gate_s.dtype == jnp.bfloat16
    assert jnp.allclose(out_s.astype(jnp.float32), ref_out, atol=7.5e-2, rtol=7.5e-2)
    assert jnp.allclose(gate_s.astype(jnp.float32), ref_gate, atol=7.5e-2, rtol=7.5e-2)

    print("KERNEL_OK")
</pallas_src>

<mosaic_0001>
module attributes {stable_mosaic.version = 11 : i64} {
  func.func @_glu_kernel(%arg0: i32, %arg1: memref<16x32xf32, #tpu.memory_space<vmem>>, %arg2: memref<32x64xf32, #tpu.memory_space<vmem>>, %arg3: memref<1x64xf32, #tpu.memory_space<vmem>>, %arg4: memref<16x64xf32, #tpu.memory_space<vmem>>) attributes {dimension_semantics = [#tpu.dimension_semantics<parallel>], iteration_bounds = array<i64: 1>, scalar_prefetch = 0 : i64, scratch_operands = 0 : i64, tpu.core_type = #tpu.core_type<tc>, window_params = [{transform_indices = @transform_0, window_bounds = array<i64: 16, 32>}, {pipeline_mode = #tpu.pipeline_mode<synchronous>, transform_indices = @transform_1, window_bounds = array<i64: 32, 64>}, {pipeline_mode = #tpu.pipeline_mode<synchronous>, transform_indices = @transform_2, window_bounds = array<i64: 1, 64>}, {transform_indices = @transform_3, window_bounds = array<i64: 16, 64>}]} {
    %c0 = arith.constant 0 : index
    %c0_0 = arith.constant 0 : index
    %0 = vector.load %arg1[%c0, %c0_0] : memref<16x32xf32, #tpu.memory_space<vmem>>, vector<16x32xf32>
    %c0_1 = arith.constant 0 : index
    %c0_2 = arith.constant 0 : index
    %1 = vector.load %arg2[%c0_1, %c0_2] : memref<32x64xf32, #tpu.memory_space<vmem>>, vector<32x64xf32>
    %cst = arith.constant dense<0.000000e+00> : vector<16x64xf32>
    %2 = tpu.matmul %0, %1, %cst {dimension_numbers = #tpu.dot_dimension_numbers<[1], [0], [0], [1], [0, 0, 1, 1], [], []>} : vector<16x32xf32>, vector<32x64xf32>, vector<16x64xf32> -> vector<16x64xf32>
    %c0_3 = arith.constant 0 : index
    %c0_4 = arith.constant 0 : index
    %3 = vector.load %arg3[%c0_3, %c0_4] : memref<1x64xf32, #tpu.memory_space<vmem>>, vector<1x64xf32>
    %4 = vector.broadcast %3 : vector<1x64xf32> to vector<16x64xf32>
    %5 = arith.addf %2, %4 : vector<16x64xf32>
    %6 = vector.extract_strided_slice %5 {offsets = [0, 0], sizes = [16, 32], strides = [1, 1]} : vector<16x64xf32> to vector<16x32xf32>
    %7 = vector.extract_strided_slice %5 {offsets = [0, 32], sizes = [16, 32], strides = [1, 1]} : vector<16x64xf32> to vector<16x32xf32>
    %8 = arith.negf %7 : vector<16x32xf32>
    %9 = math.exp %8 : vector<16x32xf32>
    %cst_5 = arith.constant 1.000000e+00 : f32
    %10 = vector.broadcast %cst_5 : f32 to vector<16x32xf32>
    %11 = arith.addf %10, %9 : vector<16x32xf32>
    %12 = arith.divf %10, %11 : vector<16x32xf32>
    %13 = arith.mulf %6, %12 : vector<16x32xf32>
    %14 = tpu.concatenate %13, %12 in 1 : vector<16x32xf32>, vector<16x32xf32> -> vector<16x64xf32>
    %c0_6 = arith.constant 0 : index
    %c0_7 = arith.constant 0 : index
    %15 = vector.load %arg4[%c0_6, %c0_7] : memref<16x64xf32, #tpu.memory_space<vmem>>, vector<16x64xf32>
    tpu.vector_store %arg4[%c0_6, %c0_7], %14 {strides = array<i32>} : memref<16x64xf32, #tpu.memory_space<vmem>>, vector<16x64xf32>,
    return
  }
  func.func @transform_0(%arg0: i32) -> (i32, i32) {
    %c0_i32 = arith.constant 0 : i32
    %c0_i32_0 = arith.constant 0 : i32
    return %arg0, %c0_i32 : i32, i32
  }
  func.func @transform_1(%arg0: i32) -> (i32, i32) {
    %c0_i32 = arith.constant 0 : i32
    %c0_i32_0 = arith.constant 0 : i32
    %c0_i32_1 = arith.constant 0 : i32
    return %c0_i32, %c0_i32_0 : i32, i32
  }
  func.func @transform_2(%arg0: i32) -> (i32, i32) {
    %c0_i32 = arith.constant 0 : i32
    %c0_i32_0 = arith.constant 0 : i32
    %c0_i32_1 = arith.constant 0 : i32
    return %c0_i32, %c0_i32_0 : i32, i32
  }
  func.func @transform_3(%arg0: i32) -> (i32, i32) {
    %c0_i32 = arith.constant 0 : i32
    %c0_i32_0 = arith.constant 0 : i32
    return %arg0, %c0_i32 : i32, i32
  }
}

</mosaic_0001>

<bundles_post_ra>
// kernel: tpu_custom_call.1
= control target key start
LH: loop header
LB: loop body
LE: loop exit
PB: predicated region body
PF: predicated region fallthrough
CT: control target
= control target key end

     0   :  { %8 = vsyncpa [#allocation3], 0  ;;  %s312_s0 = inlined_call_operand.hbm [shape: f32[16,32], index: 0, kind: input, shape index: {}]   ;;  %s313_s1 = inlined_call_operand.hbm [shape: f32[32,64], index: 1, kind: input, shape index: {}]   ;;  %s314_s2 = inlined_call_operand.vmem [shape: f32[1,64], index: 2, kind: input, shape index: {}]   ;;  %s315_s3 = inlined_call_operand.hbm [shape: f32[16,64], index: 3, kind: output, shape index: {}]  }
   0x1   :  { %9 = vsyncpa [#allocation6], 0 }
   0x2   :  { %10 = vsyncpa [#allocation4], 0  ;;  %s15_s14 = sshll.u32 %s312_s0, 4  ;;  %s261_s15 = smov [#allocation2]   ;;  %s16_s14 = int_to_ptr.hbm [resolvable:$true] %s15_s14 }
   0x3   :  { %s17_s16 = sshll.u32 %s261_s15, 4  ;;  %s28_s19 = sshll.u32 %s313_s1, 4  ;;  %s18_s16 = int_to_ptr.vmem [resolvable:$true] %s17_s16  ;;  %s29_s19 = int_to_ptr.hbm [resolvable:$true] %s28_s19 }
   0x4   :  { %s262_s20 = smov 128   ;;  %s263_s21 = smov 8  }
   0x5   :  { %23 = dma.hbm_to_vmem [thread:$0]  %s16_s14, 256, %s18_s16, [#allocation3], %s262_s20, %s262_s20, %s263_s21  }
   0x6   :  { %s264_s22 = smov [#allocation5]  }
   0x7   :  { %s30_s23 = sshll.u32 %s264_s22, 4  ;;  %s31_s23 = int_to_ptr.vmem [resolvable:$true] %s30_s23 }
   0x8   :  { %36 = dma.hbm_to_vmem [thread:$0]  %s29_s19, 512, %s31_s23, [#allocation6], %s262_s20, %s262_s20, %s263_s21  }
   0x9   :  { %255 = dma.done.wait [#allocation3], 256  }
   0xa   :  { %256 = vsyncadd [#allocation3], 4294967040 }
   0xb   :  { %257 = dma.done.wait [#allocation6], 512  }
   0xc   :  { %258 = vsyncadd [#allocation6], 4294966784  ;;  %v52_v0 = vld [vmem:[#allocation5 + $0x18] sm:$0xff]  ;;  %v51_v1 = vld [vmem:[#allocation5 + $0x10] sm:$0xff]  ;;  %vm57_vm0 = vcmask 261120   ;;  %vm137_vm9 = vcmask 523264  }
   0xd   :  { %76 = vmatpush.msra.mxu0 %v52_v0  ;;  %164 = vmatpush.msra.mxu1 %v52_v0  ;;  %v50_v2 = vld [vmem:[#allocation5 + $0x8] sm:$0xff]  ;;  %v49_v3 = vld [vmem:[#allocation5] sm:$0xff]  ;;  %v47_v4 = vld [vmem:[#allocation2] sm:$0xff]  ;;  %s266_s24 = smov [#allocation7]   ;;  %s146_s28 = sshll.u32 %s315_s3, 4  ;;  %s147_s28 = int_to_ptr.hbm [resolvable:$true] %s146_s28 }
   0xe   :  { %v48_v5 = vld [vmem:[#allocation2 + $0x8] sm:$0xff]  ;;  %v174_v6 = vld [vmem:[%s314_s2] ss:$0 sm:$0xff]  ;;  %s265_s2 = smov 96   ;;  %s144_s25 = sshll.u32 %s266_s24, 4  ;;  %s145_s25 = int_to_ptr.vmem [resolvable:$true] %s144_s25 }
   0xf   :  { %77 = vmatpush.msra.mxu0 %v51_v1  ;;  %165 = vmatpush.msra.mxu1 %v51_v1 }
  0x11   :  { %78 = vmatpush.msra.mxu0 %v50_v2  ;;  %166 = vmatpush.msra.mxu1 %v50_v2 }
  0x13   :  { %79 = vmatpush.msra.mxu0 %v49_v3  ;;  %167 = vmatpush.msra.mxu1 %v49_v3 }
  0x14   :  { %160 = vmatmul.msk.f32.vlgmr.msra.gmra.mxu0 %vm57_vm0, %v47_v4  ;;  %161 = vmatmul.msk.f32.vlgmr.msra.gmra.mxu1 %vm57_vm0, %v48_v5 }
  0x91   :  { %v81_v7 = vpop.f32.mrf.mxu0  ;;  %v84_v8 = vpop.f32.mrf.mxu1 }
  0x92   :  { %v82_v9 = vadd.f32 %v174_v6, %v81_v7  ;;  %v85_v10 = vadd.f32 %v174_v6, %v84_v8 }
  0x94   :  { %v162_v11 = vmul.f32 -1.442695, %v82_v9  ;;  %v163_v12 = vmul.f32 -1.442695, %v85_v10 }
  0x96   :  { %175 = vpow2.f32 %v162_v11 }
  0x97   :  { %177 = vpow2.f32 %v163_v12 }
  0x9c   :  { %v176_v13 = vpop.eup %175 }
  0x9d   :  { %v178_v14 = vpop.eup %177  ;;  %v93_v15 = vadd.f32 1.0, %v176_v13 }
  0x9e   :  { %v94_v16 = vadd.f32 1.0, %v178_v14 }
  0x9f   :  { %179 = vrcp.f32 %v93_v15  ;;  %v106_v22 = vand.u32 2147483648, %v93_v15  ;;  %v104_v25 = vand.u32 2147483647, %v93_v15  ;;  %vm100_vm2 = vweird.f32 %v93_v15 }
  0xa0   :  { %181 = vrcp.f32 %v94_v16  ;;  %vm115_vm5 = vweird.f32 %v94_v16  ;;  %v121_v32 = vand.u32 2147483648, %v94_v16  ;;  %v119_v33 = vand.u32 2147483647, %v94_v16 }
  0xa1   :  { %v107_v28 = vor.u32 1.1754944e-38, %v106_v22  ;;  %vm105_vm4 = vcmp.eq.f32.partialorder %v104_v25, 8.507059e+37 }
  0xa2   :  { %v122_v35 = vor.u32 1.1754944e-38, %v121_v32  ;;  %vm120_vm8 = vcmp.eq.f32.partialorder %v119_v33, 8.507059e+37 }
  0xa5   :  { %v180_v17 = vpop.eup %179 }
  0xa6   :  { %v182_v18 = vpop.eup %181  ;;  %v96_v19 = vmul.f32 %v180_v17, %v93_v15  ;;  %vm101_vm1 = vweird.f32 %v180_v17 }
  0xa7   :  { %v111_v20 = vmul.f32 %v182_v18, %v94_v16  ;;  %vm102_vm3 = vmor %vm100_vm2, %vm101_vm1  ;;  %vm116_vm6 = vweird.f32 %v182_v18 }
  0xa8   :  { %v97_v21 = vsub.f32 1.0, %v96_v19  ;;  %vm117_vm7 = vmor %vm115_vm5, %vm116_vm6 }
  0xa9   :  { %v112_v23 = vsub.f32 1.0, %v111_v20 }
  0xaa   :  { %v98_v24 = vmul.f32 %v180_v17, %v97_v21 }
  0xab   :  { %v113_v27 = vmul.f32 %v182_v18, %v112_v23 }
  0xac   :  { %v99_v26 = vadd.f32 %v180_v17, %v98_v24 }
  0xad   :  { %v114_v31 = vadd.f32 %v182_v18, %v113_v27 }
  0xae   :  { %v103_v29 = vsel %vm102_vm3, %v180_v17, %v99_v26 }
  0xaf   :  { %v108_v30 = vsel %vm105_vm4, %v107_v28, %v103_v29  ;;  %v118_v34 = vsel %vm117_vm7, %v182_v18, %v114_v31 }
  0xb0   :  { %127 = vrot.lane.b32.xlu0 %v108_v30, %s265_s2  ;;  %v123_v36 = vsel %vm120_vm8, %v122_v35, %v118_v34 }
  0xb8   :  { %129 = vrot.lane.b32.xlu0 %v123_v36, %s265_s2 }
 0x122   :  { %v128_v37 = vpop.permute.xlu0 %127 }
 0x123   :  { %v133_v38 = vmul.f32 %v128_v37, %v82_v9 }
 0x125   :  { %v135_v39 = vsel %vm57_vm0, %v133_v38, %v108_v30 }
 0x126   :  { %138 = vst.msk [vmem:[#allocation7] sm:$0xff] %vm137_vm9, %v135_v39 }
 0x12a   :  { %v130_v40 = vpop.permute.xlu0 %129 }
 0x12b   :  { %v134_v41 = vmul.f32 %v130_v40, %v85_v10 }
 0x12d   :  { %v136_v42 = vsel %vm57_vm0, %v134_v41, %v123_v36 }
 0x12e   :  { %139 = vst.msk [vmem:[#allocation7 + $0x8] sm:$0xff] %vm137_vm9, %v136_v42 }
 0x12f   :  { %152 = dma.vmem_to_hbm [thread:$0]  %s145_s25, 256, %s147_s28, [#allocation4], %s262_s20, %s262_s20, %s263_s21  }
 0x130   :  { %259 = dma.done.wait [#allocation4], 256  }
 0x131   :  { %260 = vsyncadd [#allocation4], 4294967040 }
 0x132   :  { %157 = vsyncpa [#allocation3], 1 }
 0x133   :  { %158 = vsyncpa [#allocation6], 1 }
 0x134   :  { %159 = vsyncpa [#allocation4], 1 }

</bundles_post_ra>
